<compile_context>
chip_gen: v7x
topology: tpu7x:2x2x1
jax: 0.10.0
libtpu: 0.0.40
codegen_flags: <defaults>
</compile_context>

<pallas_src>
import functools

import jax
import jax.numpy as jnp
from jax import lax
from jax.experimental import pallas as pl
from jax.experimental.pallas import tpu as pltpu


def _dice_sums_kernel(p_ref, t_ref, spp_out, stt_out, spt_out,
                      spp_acc, stt_acc, spt_acc, *, rem):
    """Grid = (row blocks, reduction blocks over N); reduction axis last.

    `rem` (static Python int) is the number of valid lanes in the LAST
    reduction block (== TN when N % TN == 0).
    """
    tn = p_ref.shape[1]
    k = pl.program_id(1)
    last = pl.num_programs(1) - 1

    @pl.when(k == 0)
    def _init():
        spp_acc[...] = jnp.zeros_like(spp_acc)
        stt_acc[...] = jnp.zeros_like(stt_acc)
        spt_acc[...] = jnp.zeros_like(spt_acc)

    def accum(width):
        """Fold `width` (static) leading lanes of this block into the
        128-lane f32 accumulators.  Pure VPU multiplies/adds, no masks."""
        n_pairs = width // 256
        if n_pairs > 0:
            def pair_body(i, carry):
                c0 = pl.multiple_of(i * 256, 256)
                p0 = p_ref[:, pl.ds(c0, 128)].astype(jnp.float32)
                p1 = p_ref[:, pl.ds(c0 + 128, 128)].astype(jnp.float32)
                t0 = t_ref[:, pl.ds(c0, 128)].astype(jnp.float32)
                t1 = t_ref[:, pl.ds(c0 + 128, 128)].astype(jnp.float32)
                # Batch two chunks per scratch RMW (v5e has 1 vst slot/cycle).
                spp_acc[...] += p0 * p0 + p1 * p1
                stt_acc[...] += t0 * t0 + t1 * t1
                spt_acc[...] += p0 * t0 + p1 * t1
                return carry

            lax.fori_loop(0, n_pairs, pair_body, 0, unroll=min(8, n_pairs))

        off = n_pairs * 256
        if width - off >= 128:          # one leftover full 128-lane chunk
            p0 = p_ref[:, pl.ds(off, 128)].astype(jnp.float32)
            t0 = t_ref[:, pl.ds(off, 128)].astype(jnp.float32)
            spp_acc[...] += p0 * p0
            stt_acc[...] += t0 * t0
            spt_acc[...] += p0 * t0
            off += 128

        w = width - off                  # sub-128 tail (static width)
        if w > 0:
            p0 = p_ref[:, pl.ds(off, w)].astype(jnp.float32)
            t0 = t_ref[:, pl.ds(off, w)].astype(jnp.float32)
            spp_acc[:, :w] += p0 * p0
            stt_acc[:, :w] += t0 * t0
            spt_acc[:, :w] += p0 * t0

    if rem == tn:
        # N is a multiple of TN: every block is full width, no ragged path.
        accum(tn)
    else:
        @pl.when(k < last)
        def _fast():
            accum(tn)

        @pl.when(k == last)
        def _ragged():
            # Only the `rem` valid lanes are ever read -> no masking needed.
            accum(rem)

    @pl.when(k == last)
    def _finalize():
        spp_out[...] = jnp.sum(spp_acc[...], axis=1, keepdims=True)
        stt_out[...] = jnp.sum(stt_acc[...], axis=1, keepdims=True)
        spt_out[...] = jnp.sum(spt_acc[...], axis=1, keepdims=True)


def _round_up(x, m):
    return ((x + m - 1) // m) * m


def _choose_split(r, n):
    """For tiny R, split every row into S sub-rows (N must divide) so that
    sublanes are filled and the 'parallel' row axis has >=2 blocks (v7x)."""
    if r >= 16:
        return 1
    for s in (64, 32, 16, 8, 4, 2):
        if n % s == 0 and (n // s) >= 512 and r * s <= 1024:
            return s
    return 1


@jax.jit
def dice_loss(pred, truth):
    """Pallas implementation of Dice_loss.forward (3-D or 4-D inputs)."""
    if pred.ndim == 3:
        B = pred.shape[0]
        R = B
        N = pred.shape[1] * pred.shape[2]
    elif pred.ndim == 4:
        B = pred.shape[0]
        R = pred.shape[0] * pred.shape[1]
        N = pred.shape[2] * pred.shape[3]
    else:
        raise ValueError("Dice_loss expects 3-D or 4-D inputs")

    # Optional row split for tiny R (pure reshape; sums are recombined below).
    split = _choose_split(R, N)
    Rp, Np = R * split, N // split
    p2 = pred.reshape(Rp, Np)
    t2 = truth.reshape(Rp, Np)

    itemsize = jnp.dtype(pred.dtype).itemsize
    sub = 16 if itemsize < 4 else 8      # bf16 sublane packing prefers 16

    # ---- Row block: <= 128 rows, multiple of `sub` (or the full row extent
    # for tiny Rp).  Prefer >= 2 row blocks so the "parallel" row axis can use
    # both TensorCores on v7x.
    TR_MAX = 128
    if Rp <= TR_MAX:
        if Rp > 2 * sub:
            tr = _round_up(pl.cdiv(Rp, 2), sub)
            TR = tr if tr < Rp else Rp
        else:
            TR = Rp
    else:
        TR = TR_MAX

    # ---- Reduction block: dtype-aware, ~2 MiB per input block (2 inputs x 2
    # pipeline buffers ~ 8 MiB VMEM -> safe on every generation's scoped
    # budget).  Multiple of 256 so the paired chunk loop has no remainder.
    target_block_bytes = 2 * 1024 * 1024
    tn_budget = target_block_bytes // (max(TR, sub) * itemsize)
    TN_MAX = max(512, min(32768, (tn_budget // 256) * 256))
    TN = Np if Np <= TN_MAX else TN_MAX   # full-dim block when N fits

    grid_r = pl.cdiv(Rp, TR)
    grid_k = pl.cdiv(Np, TN)
    rem = Np - (grid_k - 1) * TN          # valid lanes in the last N block

    in_spec = pl.BlockSpec((TR, TN), lambda i, k: (i, k))
    out_spec = pl.BlockSpec((TR, 1), lambda i, k: (i, 0))
    out_rows = grid_r * TR

    spp, stt, spt = pl.pallas_call(
        functools.partial(_dice_sums_kernel, rem=rem),
        out_shape=tuple(jax.ShapeDtypeStruct((out_rows, 1), jnp.float32)
                        for _ in range(3)),
        grid_spec=pltpu.PrefetchScalarGridSpec(
            num_scalar_prefetch=0,
            grid=(grid_r, grid_k),
            in_specs=[in_spec, in_spec],
            out_specs=[out_spec, out_spec, out_spec],
            scratch_shapes=[pltpu.VMEM((TR, 128), jnp.float32)] * 3,
        ),
        compiler_params=pltpu.CompilerParams(
            dimension_semantics=("parallel", "arbitrary"),
            vmem_limit_bytes=32 * 1024 * 1024,
        ),
        cost_estimate=pl.CostEstimate(
            flops=6 * Rp * Np,
            transcendentals=0,
            bytes_accessed=2 * Rp * Np * itemsize + 3 * 4 * out_rows,
        ),
    )(p2, t2)

    # Drop padded / garbage overhang rows BEFORE any reduction (load-bearing).
    spp = spp[:Rp, 0]
    stt = stt[:Rp, 0]
    spt = spt[:Rp, 0]
    if split > 1:
        spp = jnp.sum(spp.reshape(R, split), axis=1)
        stt = jnp.sum(stt.reshape(R, split), axis=1)
        spt = jnp.sum(spt.reshape(R, split), axis=1)

    # Matches the PyTorch reference exactly: no epsilon on the denominator.
    loss_rows = (spp + stt) / (2.0 * spt) - 1.0
    return jnp.sum(loss_rows) / B


def _reference(pred, truth):
    axes = (1, 2) if pred.ndim == 3 else (2, 3)
    sp = jnp.sum(pred * pred, axes)
    st = jnp.sum(truth * truth, axes)
    sc = jnp.sum(pred * truth, axes)
    return jnp.sum((sp + st) / (2.0 * sc) - 1.0) / pred.shape[0]


if __name__ == "__main__":
    key = jax.random.PRNGKey(0)
    k1, k2, k3, k4 = jax.random.split(key, 4)

    # 4-D NCHW case: (2, 4, 16, 16).  Values strictly positive so the
    # cross-term denominator is well defined (the reference has no epsilon).
    pred4 = jax.random.uniform(k1, (2, 4, 16, 16), jnp.float32, 0.1, 1.0)
    truth4 = jax.random.uniform(k2, (2, 4, 16, 16), jnp.float32, 0.1, 1.0)
    loss4 = jax.block_until_ready(dice_loss(pred4, truth4))
    ref4 = _reference(pred4, truth4)
    assert jnp.allclose(loss4, ref4, rtol=1e-5, atol=1e-5), (loss4, ref4)

    # 3-D case: (2, 16, 16).
    pred3 = jax.random.uniform(k3, (2, 16, 16), jnp.float32, 0.1, 1.0)
    truth3 = jax.random.uniform(k4, (2, 16, 16), jnp.float32, 0.1, 1.0)
    loss3 = jax.block_until_ready(dice_loss(pred3, truth3))
    ref3 = _reference(pred3, truth3)
    assert jnp.allclose(loss3, ref3, rtol=1e-5, atol=1e-5), (loss3, ref3)

    print("KERNEL_OK")
</pallas_src>

<mosaic_0001>
module attributes {stable_mosaic.version = 11 : i64} {
  func.func @_dice_sums_kernel(%arg0: i32, %arg1: i32, %arg2: memref<8x256xf32, #tpu.memory_space<vmem>>, %arg3: memref<8x256xf32, #tpu.memory_space<vmem>>, %arg4: memref<8x1xf32, #tpu.memory_space<vmem>>, %arg5: memref<8x1xf32, #tpu.memory_space<vmem>>, %arg6: memref<8x1xf32, #tpu.memory_space<vmem>>, %arg7: memref<8x128xf32, #tpu.memory_space<vmem>>, %arg8: memref<8x128xf32, #tpu.memory_space<vmem>>, %arg9: memref<8x128xf32, #tpu.memory_space<vmem>>) attributes {dimension_semantics = [#tpu.dimension_semantics<parallel>, #tpu.dimension_semantics<arbitrary>], iteration_bounds = array<i64: 1, 1>, scalar_prefetch = 0 : i64, scratch_operands = 3 : i64, tpu.core_type = #tpu.core_type<tc>, window_params = [{transform_indices = @transform_0, window_bounds = array<i64: 8, 256>}, {transform_indices = @transform_1, window_bounds = array<i64: 8, 256>}, {transform_indices = @transform_2, window_bounds = array<i64: 8, 1>}, {transform_indices = @transform_3, window_bounds = array<i64: 8, 1>}, {transform_indices = @transform_4, window_bounds = array<i64: 8, 1>}]} {
    %c0_i32 = arith.constant 0 : i32
    %0 = arith.cmpi eq, %arg1, %c0_i32 : i32
    %1 = arith.extui %0 : i1 to i32
    %c0_i32_0 = arith.constant 0 : i32
    %2 = arith.cmpi ne, %1, %c0_i32_0 : i32
    scf.if %2 {
      %cst = arith.constant 0.000000e+00 : f32
      %36 = vector.broadcast %cst : f32 to vector<8x128xf32>
      %c0_20 = arith.constant 0 : index
      %c0_21 = arith.constant 0 : index
      %37 = vector.load %arg7[%c0_20, %c0_21] : memref<8x128xf32, #tpu.memory_space<vmem>>, vector<8x128xf32>
      tpu.vector_store %arg7[%c0_20, %c0_21], %36 {strides = array<i32>} : memref<8x128xf32, #tpu.memory_space<vmem>>, vector<8x128xf32>,
      %cst_22 = arith.constant 0.000000e+00 : f32
      %38 = vector.broadcast %cst_22 : f32 to vector<8x128xf32>
      %c0_23 = arith.constant 0 : index
      %c0_24 = arith.constant 0 : index
      %39 = vector.load %arg8[%c0_23, %c0_24] : memref<8x128xf32, #tpu.memory_space<vmem>>, vector<8x128xf32>
      tpu.vector_store %arg8[%c0_23, %c0_24], %38 {strides = array<i32>} : memref<8x128xf32, #tpu.memory_space<vmem>>, vector<8x128xf32>,
      %cst_25 = arith.constant 0.000000e+00 : f32
      %40 = vector.broadcast %cst_25 : f32 to vector<8x128xf32>
      %c0_26 = arith.constant 0 : index
      %c0_27 = arith.constant 0 : index
      %41 = vector.load %arg9[%c0_26, %c0_27] : memref<8x128xf32, #tpu.memory_space<vmem>>, vector<8x128xf32>
      tpu.vector_store %arg9[%c0_26, %c0_27], %40 {strides = array<i32>} : memref<8x128xf32, #tpu.memory_space<vmem>>, vector<8x128xf32>,
    } else {
    }
    %c0_i32_1 = arith.constant 0 : i32
    %c256_i32 = arith.constant 256 : i32
    %3 = arith.muli %c0_i32_1, %c256_i32 : i32
    %4 = tpu.assume_multiple %3, 256 : i32
    %c0 = arith.constant 0 : index
    %5 = arith.index_cast %4 : i32 to index
    %6 = vector.load %arg2[%c0, %5] : memref<8x256xf32, #tpu.memory_space<vmem>>, vector<8x128xf32>
    %c128_i32 = arith.constant 128 : i32
    %7 = arith.addi %4, %c128_i32 : i32
    %c0_2 = arith.constant 0 : index
    %8 = arith.index_cast %7 : i32 to index
    %9 = vector.load %arg2[%c0_2, %8] : memref<8x256xf32, #tpu.memory_space<vmem>>, vector<8x128xf32>
    %c0_3 = arith.constant 0 : index
    %10 = arith.index_cast %4 : i32 to index
    %11 = vector.load %arg3[%c0_3, %10] : memref<8x256xf32, #tpu.memory_space<vmem>>, vector<8x128xf32>
    %c128_i32_4 = arith.constant 128 : i32
    %12 = arith.addi %4, %c128_i32_4 : i32
    %c0_5 = arith.constant 0 : index
    %13 = arith.index_cast %12 : i32 to index
    %14 = vector.load %arg3[%c0_5, %13] : memref<8x256xf32, #tpu.memory_space<vmem>>, vector<8x128xf32>
    %c0_6 = arith.constant 0 : index
    %c0_7 = arith.constant 0 : index
    %15 = vector.load %arg7[%c0_6, %c0_7] : memref<8x128xf32, #tpu.memory_space<vmem>>, vector<8x128xf32>
    %16 = arith.mulf %6, %6 : vector<8x128xf32>
    %17 = arith.mulf %9, %9 : vector<8x128xf32>
    %18 = arith.addf %16, %17 : vector<8x128xf32>
    %19 = arith.addf %15, %18 : vector<8x128xf32>
    %c0_8 = arith.constant 0 : index
    %c0_9 = arith.constant 0 : index
    %20 = vector.load %arg7[%c0_8, %c0_9] : memref<8x128xf32, #tpu.memory_space<vmem>>, vector<8x128xf32>
    tpu.vector_store %arg7[%c0_8, %c0_9], %19 {strides = array<i32>} : memref<8x128xf32, #tpu.memory_space<vmem>>, vector<8x128xf32>,
    %c0_10 = arith.constant 0 : index
    %c0_11 = arith.constant 0 : index
    %21 = vector.load %arg8[%c0_10, %c0_11] : memref<8x128xf32, #tpu.memory_space<vmem>>, vector<8x128xf32>
    %22 = arith.mulf %11, %11 : vector<8x128xf32>
    %23 = arith.mulf %14, %14 : vector<8x128xf32>
    %24 = arith.addf %22, %23 : vector<8x128xf32>
    %25 = arith.addf %21, %24 : vector<8x128xf32>
    %c0_12 = arith.constant 0 : index
    %c0_13 = arith.constant 0 : index
    %26 = vector.load %arg8[%c0_12, %c0_13] : memref<8x128xf32, #tpu.memory_space<vmem>>, vector<8x128xf32>
    tpu.vector_store %arg8[%c0_12, %c0_13], %25 {strides = array<i32>} : memref<8x128xf32, #tpu.memory_space<vmem>>, vector<8x128xf32>,
    %c0_14 = arith.constant 0 : index
    %c0_15 = arith.constant 0 : index
    %27 = vector.load %arg9[%c0_14, %c0_15] : memref<8x128xf32, #tpu.memory_space<vmem>>, vector<8x128xf32>
    %28 = arith.mulf %6, %11 : vector<8x128xf32>
    %29 = arith.mulf %9, %14 : vector<8x128xf32>
    %30 = arith.addf %28, %29 : vector<8x128xf32>
    %31 = arith.addf %27, %30 : vector<8x128xf32>
    %c0_16 = arith.constant 0 : index
    %c0_17 = arith.constant 0 : index
    %32 = vector.load %arg9[%c0_16, %c0_17] : memref<8x128xf32, #tpu.memory_space<vmem>>, vector<8x128xf32>
    tpu.vector_store %arg9[%c0_16, %c0_17], %31 {strides = array<i32>} : memref<8x128xf32, #tpu.memory_space<vmem>>, vector<8x128xf32>,
    %c1_i32 = arith.constant 1 : i32
    %c0_i32_18 = arith.constant 0 : i32
    %33 = arith.cmpi eq, %arg1, %c0_i32_18 : i32
    %34 = arith.extui %33 : i1 to i32
    %c0_i32_19 = arith.constant 0 : i32
    %35 = arith.cmpi ne, %34, %c0_i32_19 : i32
    scf.if %35 {
      %c0_20 = arith.constant 0 : index
      %c0_21 = arith.constant 0 : index
      %36 = vector.load %arg7[%c0_20, %c0_21] : memref<8x128xf32, #tpu.memory_space<vmem>>, vector<8x128xf32>
      %cst = arith.constant dense<0.000000e+00> : vector<8xf32>
      %37 = vector.multi_reduction <add>, %36, %cst [1] : vector<8x128xf32> to vector<8xf32>
      %38 = vector.shape_cast %37 : vector<8xf32> to vector<8x1xf32>
      %c0_22 = arith.constant 0 : index
      %c0_23 = arith.constant 0 : index
      %39 = vector.load %arg4[%c0_22, %c0_23] : memref<8x1xf32, #tpu.memory_space<vmem>>, vector<8x1xf32>
      tpu.vector_store %arg4[%c0_22, %c0_23], %38 {strides = array<i32>} : memref<8x1xf32, #tpu.memory_space<vmem>>, vector<8x1xf32>,
      %c0_24 = arith.constant 0 : index
      %c0_25 = arith.constant 0 : index
      %40 = vector.load %arg8[%c0_24, %c0_25] : memref<8x128xf32, #tpu.memory_space<vmem>>, vector<8x128xf32>
      %cst_26 = arith.constant dense<0.000000e+00> : vector<8xf32>
      %41 = vector.multi_reduction <add>, %40, %cst_26 [1] : vector<8x128xf32> to vector<8xf32>
      %42 = vector.shape_cast %41 : vector<8xf32> to vector<8x1xf32>
      %c0_27 = arith.constant 0 : index
      %c0_28 = arith.constant 0 : index
      %43 = vector.load %arg5[%c0_27, %c0_28] : memref<8x1xf32, #tpu.memory_space<vmem>>, vector<8x1xf32>
      tpu.vector_store %arg5[%c0_27, %c0_28], %42 {strides = array<i32>} : memref<8x1xf32, #tpu.memory_space<vmem>>, vector<8x1xf32>,
      %c0_29 = arith.constant 0 : index
      %c0_30 = arith.constant 0 : index
      %44 = vector.load %arg9[%c0_29, %c0_30] : memref<8x128xf32, #tpu.memory_space<vmem>>, vector<8x128xf32>
      %cst_31 = arith.constant dense<0.000000e+00> : vector<8xf32>
      %45 = vector.multi_reduction <add>, %44, %cst_31 [1] : vector<8x128xf32> to vector<8xf32>
      %46 = vector.shape_cast %45 : vector<8xf32> to vector<8x1xf32>
      %c0_32 = arith.constant 0 : index
      %c0_33 = arith.constant 0 : index
      %47 = vector.load %arg6[%c0_32, %c0_33] : memref<8x1xf32, #tpu.memory_space<vmem>>, vector<8x1xf32>
      tpu.vector_store %arg6[%c0_32, %c0_33], %46 {strides = array<i32>} : memref<8x1xf32, #tpu.memory_space<vmem>>, vector<8x1xf32>,
    } else {
    }
    return
  }
  func.func @transform_0(%arg0: i32, %arg1: i32) -> (i32, i32) {
    %c0_i32 = arith.constant 0 : i32
    return %arg0, %arg1 : i32, i32
  }
  func.func @transform_1(%arg0: i32, %arg1: i32) -> (i32, i32) {
    %c0_i32 = arith.constant 0 : i32
    return %arg0, %arg1 : i32, i32
  }
  func.func @transform_2(%arg0: i32, %arg1: i32) -> (i32, i32) {
    %c0_i32 = arith.constant 0 : i32
    %c0_i32_0 = arith.constant 0 : i32
    return %arg0, %c0_i32 : i32, i32
  }
  func.func @transform_3(%arg0: i32, %arg1: i32) -> (i32, i32) {
    %c0_i32 = arith.constant 0 : i32
    %c0_i32_0 = arith.constant 0 : i32
    return %arg0, %c0_i32 : i32, i32
  }
  func.func @transform_4(%arg0: i32, %arg1: i32) -> (i32, i32) {
    %c0_i32 = arith.constant 0 : i32
    %c0_i32_0 = arith.constant 0 : i32
    return %arg0, %c0_i32 : i32, i32
  }
}

</mosaic_0001>

<bundles_post_ra>
// kernel: dice_loss.1
= control target key start
LH: loop header
LB: loop body
LE: loop exit
PB: predicated region body
PF: predicated region fallthrough
CT: control target
= control target key end

     0   :  { %vm56_vm0 = vcmask 7168   ;;  %s130_s0 = inlined_call_operand.vmem [shape: f32[8,256], index: 0, kind: input, shape index: {}]   ;;  %s131_s1 = inlined_call_operand.vmem [shape: f32[8,256], index: 1, kind: input, shape index: {}]   ;;  %s132_s2 = inlined_call_operand.vmem [shape: f32[8,1], index: 2, kind: output, shape index: {0}]   ;;  %s133_s4 = inlined_call_operand.vmem [shape: f32[8,1], index: 4, kind: output, shape index: {2}]   ;;  %s134_s3 = inlined_call_operand.vmem [shape: f32[8,1], index: 3, kind: output, shape index: {1}]  }
   0x1   :  { %v21_v0 = vld [vmem:[%s130_s0] sm:$0xff]  ;;  %v82_v1 = vld [vmem:[%s130_s0 + $0x8] sm:$0xff] }
   0x2   :  { %v28_v2 = vld [vmem:[%s131_s1] sm:$0xff]  ;;  %v33_v3 = vmul.f32 %v21_v0, %v21_v0  ;;  %v34_v4 = vmul.f32 %v82_v1, %v82_v1  ;;  %v83_v5 = vld [vmem:[%s131_s1 + $0x8] sm:$0xff] }
   0x3   :  { %v45_v6 = vmul.f32 %v28_v2, %v21_v0  ;;  %v39_v7 = vmul.f32 %v28_v2, %v28_v2  ;;  %v46_v8 = vmul.f32 %v83_v5, %v82_v1  ;;  %v40_v9 = vmul.f32 %v83_v5, %v83_v5 }
   0x4   :  { %v35_v10 = vadd.f32 %v34_v4, %v33_v3 }
   0x5   :  { %v47_v11 = vadd.f32 %v46_v8, %v45_v6  ;;  %v41_v12 = vadd.f32 %v40_v9, %v39_v7 }
   0x6   :  { %54 = vadd.xlane.f32.xlu0 %v35_v10 }
   0x7   :  { %63 = vadd.xlane.f32.xlu1 %v47_v11 }
   0xa   :  { %59 = vadd.xlane.f32.xlu0 %v41_v12 }
  0x93   :  { %v55_v13 = vpop.xlane.xlu0 %54 }
  0x94   :  { %57 = vst.msk [vmem:[%s132_s2] sm:$0xff] %vm56_vm0, %v55_v13  ;;  %v64_v14 = vpop.xlane.xlu1 %63 }
  0x95   :  { %65 = vst.msk [vmem:[%s133_s4] sm:$0xff] %vm56_vm0, %v64_v14 }
  0x97   :  { %v60_v15 = vpop.xlane.xlu0 %59 }
  0x98   :  { %61 = vst.msk [vmem:[%s134_s3] sm:$0xff] %vm56_vm0, %v60_v15 }

</bundles_post_ra>
